<compile_context>
chip_gen: v5e
topology: v5e:2x2
jax: 0.10.0
libtpu: 0.0.40
codegen_flags: <defaults>
</compile_context>

<pallas_src>
import jax
import jax.numpy as jnp
from jax.experimental import pallas as pl
from jax.experimental.pallas import tpu as pltpu

NUM_GRU_STEPS = 2   # GatedGraphConv(out_channels, num_layers=2)
LANE = 128


def _round_up(x, m):
    return (x + m - 1) // m * m


def _gated_graph_conv_kernel(x_ref, adj_ref, w_ref, wih_ref, whh_ref,
                             bih_ref, bhh_ref, o_ref):
    """One grid step: a stacked slab of B samples x C nodes -> (B*C, Fp)."""
    M, Fp = x_ref.shape
    x = x_ref[...]                       # (M, Fp) f32 hidden state
    adj = adj_ref[...]                   # (M, M)  f32 block-diagonal adjacency

    # Hoist bias broadcasts out of the unrolled step loop (JAX does not CSE
    # broadcast_in_dim).  Gate order: 0 = r, 1 = z, 2 = n (PyTorch GRUCell).
    b_r = jnp.broadcast_to(bih_ref[0] + bhh_ref[0], (M, Fp))
    b_z = jnp.broadcast_to(bih_ref[1] + bhh_ref[1], (M, Fp))
    b_in = jnp.broadcast_to(bih_ref[2], (M, Fp))
    b_hn = jnp.broadcast_to(bhh_ref[2], (M, Fp))

    for step in range(NUM_GRU_STEPS):    # unrolled at trace time
        xb = x.astype(jnp.bfloat16)
        # message: m_j = x_j @ W[step]; then sum-aggregate over incoming edges
        m = jnp.dot(xb, w_ref[step], preferred_element_type=jnp.float32)
        m = jnp.dot(adj, m, preferred_element_type=jnp.float32)
        mb = m.astype(jnp.bfloat16)
        # GRUCell(input=m, hidden=x) with lane-aligned per-gate matmuls
        gi_r = jnp.dot(mb, wih_ref[0], preferred_element_type=jnp.float32)
        gi_z = jnp.dot(mb, wih_ref[1], preferred_element_type=jnp.float32)
        gi_n = jnp.dot(mb, wih_ref[2], preferred_element_type=jnp.float32)
        gh_r = jnp.dot(xb, whh_ref[0], preferred_element_type=jnp.float32)
        gh_z = jnp.dot(xb, whh_ref[1], preferred_element_type=jnp.float32)
        gh_n = jnp.dot(xb, whh_ref[2], preferred_element_type=jnp.float32)
        r = jax.nn.sigmoid(gi_r + gh_r + b_r)
        z = jax.nn.sigmoid(gi_z + gh_z + b_z)
        n = jnp.tanh(gi_n + b_in + r * (gh_n + b_hn))
        x = (1.0 - z) * n + z * x
    o_ref[...] = x


def _repack_params(params, Fp):
    """Pad to lane-aligned Fp, split GRU weights per gate, cast weights to bf16."""
    w = params["weight"].astype(jnp.float32)                  # (L, F, F)
    L, F, _ = w.shape
    pad = Fp - F
    w = jnp.pad(w, ((0, 0), (0, pad), (0, pad))).astype(jnp.bfloat16)

    def split_cols(wt):                                       # (F, 3F) -> (3, Fp, Fp)
        wt = wt.astype(jnp.float32).reshape(F, 3, F).transpose(1, 0, 2)
        return jnp.pad(wt, ((0, 0), (0, pad), (0, pad))).astype(jnp.bfloat16)

    def split_bias(b):                                        # (1, 3F) -> (3, 1, Fp)
        b = b.astype(jnp.float32).reshape(3, 1, F)
        return jnp.pad(b, ((0, 0), (0, 0), (0, pad)))

    return (w, split_cols(params["wih_t"]), split_cols(params["whh_t"]),
            split_bias(params["bih"]), split_bias(params["bhh"]))


def model_gnn_paf_forward(cnn_output, layer_params, adj, gnn_iterations=None,
                          samples_per_step=8):
    """cnn_output: (N, C, H, W) float32.  gnn_iterations unused (as in torch)."""
    del gnn_iterations
    N, C, H, W = cnn_output.shape
    # The torch loop applies every GGC layer to the ORIGINAL input and keeps
    # only the last layer's result -> only the last layer's params matter.
    params = layer_params[-1]
    F = params["weight"].shape[-1]                 # out_channels
    L = params["weight"].shape[0]
    assert H * W <= F, "GatedGraphConv requires in_channels <= out_channels"
    Fp = _round_up(F, LANE)                        # lane-aligned feature width

    # Zero-pad node features: H*W -> F (PyG semantics) -> Fp (lane alignment).
    # Padded weight rows/cols are zero, so padded feature columns stay zero.
    x = cnn_output.reshape(N, C, H * W).astype(jnp.float32)
    x = jnp.pad(x, ((0, 0), (0, 0), (0, Fp - H * W)))

    # Batch B samples into the matmul M dimension to amortize weight traffic.
    B = max(1, min(samples_per_step, N))
    G = -(-N // B)
    n_pad = G * B - N
    if n_pad:
        x = jnp.pad(x, ((0, n_pad), (0, 0), (0, 0)))
    BC = B * C
    x = x.reshape(G, BC, Fp)

    # Shared graph replicated as a block-diagonal (dst, src) adjacency.
    adj_bd = jnp.kron(jnp.eye(B, dtype=jnp.float32), adj.astype(jnp.float32))

    w, wih, whh, bih, bhh = _repack_params(params, Fp)

    # Explicit scoped-VMEM budget: weights single-buffered + I/O double-buffered
    # + temporaries, with headroom (capped so it fits every generation).
    est = ((L + 6) * Fp * Fp * 2 + 6 * Fp * 4 + BC * BC * 4
           + 2 * 2 * BC * Fp * 4 + 12 * BC * Fp * 4)
    vmem_limit = int(min(64 << 20, max(32 << 20, 1.4 * est)))

    def const_spec(shape):
        nd = len(shape)
        return pl.BlockSpec(shape, lambda g: (0,) * nd,
                            pipeline_mode=pl.Buffered(buffer_count=1))

    out = pl.pallas_call(
        _gated_graph_conv_kernel,
        out_shape=jax.ShapeDtypeStruct((G, BC, Fp), jnp.float32),
        grid_spec=pltpu.PrefetchScalarGridSpec(
            num_scalar_prefetch=0,
            grid=(G,),
            in_specs=[
                pl.BlockSpec((pl.Squeezed(), BC, Fp), lambda g: (g, 0, 0)),  # x slab
                const_spec((BC, BC)),          # block-diagonal adjacency
                const_spec((L, Fp, Fp)),       # GGC propagation weights (bf16)
                const_spec((3, Fp, Fp)),       # GRU W_ih per gate (bf16)
                const_spec((3, Fp, Fp)),       # GRU W_hh per gate (bf16)
                const_spec((3, 1, Fp)),        # b_ih per gate
                const_spec((3, 1, Fp)),        # b_hh per gate
            ],
            out_specs=pl.BlockSpec((pl.Squeezed(), BC, Fp), lambda g: (g, 0, 0)),
        ),
        compiler_params=pltpu.CompilerParams(
            dimension_semantics=("parallel",),
            vmem_limit_bytes=vmem_limit),
    )(x, adj_bd, w, wih, whh, bih, bhh)

    gnn_final = out.reshape(G * B, C, Fp)[:N, :, :H * W].reshape(N, C, H, W)
    return gnn_final


def init_layer_params(key, out_channels):
    """Deterministic GatedGraphConv(out_channels, 2) + GRUCell parameters
    in PyTorch-like layout (repacked/padded inside the wrapper)."""
    F = out_channels
    k = jax.random.split(key, 5)
    scale = 1.0 / jnp.sqrt(F)
    return {
        # weight: (num_layers, F, F) like PyG's GatedGraphConv.weight
        "weight": jax.random.uniform(k[0], (NUM_GRU_STEPS, F, F), jnp.float32,
                                     -scale, scale),
        # GRUCell weights stored pre-transposed: (F, 3F), gate order r, z, n
        "wih_t": jax.random.uniform(k[1], (F, 3 * F), jnp.float32, -scale, scale),
        "whh_t": jax.random.uniform(k[2], (F, 3 * F), jnp.float32, -scale, scale),
        "bih": jax.random.uniform(k[3], (1, 3 * F), jnp.float32, -scale, scale),
        "bhh": jax.random.uniform(k[4], (1, 3 * F), jnp.float32, -scale, scale),
    }


def build_adjacency(edge_index, num_nodes):
    """Dense (dst, src) adjacency implementing PyG sum-aggregation via matmul."""
    src, dst = edge_index
    adj = jnp.zeros((num_nodes, num_nodes), jnp.float32)
    return adj.at[dst, src].add(1.0)


if __name__ == "__main__":
    # Small stand-in for the real sizes (N, 38, 46, 46) with out_channels=2116.
    N, C, H, W = 4, 8, 8, 8
    OUT_CHANNELS = 100          # deliberately NOT a 128 multiple: exercises padding
    GNN_LAYERS = 2

    key = jax.random.PRNGKey(0)
    k_x, k_p = jax.random.split(key)

    cnn_output = jax.random.normal(k_x, (N, C, H, W), jnp.float32)

    layer_keys = jax.random.split(k_p, GNN_LAYERS)
    layer_params = [init_layer_params(lk, OUT_CHANNELS) for lk in layer_keys]

    # TODO(synk): the real `edge_index_paf` (PAF skeleton graph) is an external
    # global in the original repo; use a deterministic synthetic ring graph here.
    src = list(range(C - 1)) + list(range(1, C)) + [0, C - 1]
    dst = list(range(1, C)) + list(range(C - 1)) + [C - 1, 0]
    edge_index = jnp.array([src, dst], jnp.int32)
    adj = build_adjacency(edge_index, C)

    out = model_gnn_paf_forward(cnn_output, layer_params, adj,
                                gnn_iterations=GNN_LAYERS, samples_per_step=2)
    out = jax.block_until_ready(out)
    assert out.shape == (N, C, H, W) and out.dtype == jnp.float32
    assert bool(jnp.all(jnp.isfinite(out)))
    print("KERNEL_OK")
</pallas_src>

<mosaic_0001>
module attributes {stable_mosaic.version = 11 : i64} {
  func.func @_gated_graph_conv_kernel(%arg0: i32, %arg1: memref<1x16x128xf32, #tpu.memory_space<vmem>>, %arg2: memref<16x16xf32, #tpu.memory_space<vmem>>, %arg3: memref<2x128x128xbf16, #tpu.memory_space<vmem>>, %arg4: memref<3x128x128xbf16, #tpu.memory_space<vmem>>, %arg5: memref<3x128x128xbf16, #tpu.memory_space<vmem>>, %arg6: memref<3x1x128xf32, #tpu.memory_space<vmem>>, %arg7: memref<3x1x128xf32, #tpu.memory_space<vmem>>, %arg8: memref<1x16x128xf32, #tpu.memory_space<vmem>>) attributes {dimension_semantics = [#tpu.dimension_semantics<parallel>], iteration_bounds = array<i64: 2>, scalar_prefetch = 0 : i64, scratch_operands = 0 : i64, tpu.core_type = #tpu.core_type<tc>, window_params = [{transform_indices = @transform_0, window_bounds = array<i64: 1, 16, 128>}, {pipeline_mode = #tpu.pipeline_mode<synchronous>, transform_indices = @transform_1, window_bounds = array<i64: 16, 16>}, {pipeline_mode = #tpu.pipeline_mode<synchronous>, transform_indices = @transform_2, window_bounds = array<i64: 2, 128, 128>}, {pipeline_mode = #tpu.pipeline_mode<synchronous>, transform_indices = @transform_3, window_bounds = array<i64: 3, 128, 128>}, {pipeline_mode = #tpu.pipeline_mode<synchronous>, transform_indices = @transform_4, window_bounds = array<i64: 3, 128, 128>}, {pipeline_mode = #tpu.pipeline_mode<synchronous>, transform_indices = @transform_5, window_bounds = array<i64: 3, 1, 128>}, {pipeline_mode = #tpu.pipeline_mode<synchronous>, transform_indices = @transform_6, window_bounds = array<i64: 3, 1, 128>}, {transform_indices = @transform_7, window_bounds = array<i64: 1, 16, 128>}]} {
    %c0 = arith.constant 0 : index
    %c0_0 = arith.constant 0 : index
    %c0_1 = arith.constant 0 : index
    %0 = vector.load %arg1[%c0, %c0_0, %c0_1] : memref<1x16x128xf32, #tpu.memory_space<vmem>>, vector<1x16x128xf32>
    %1 = vector.shape_cast %0 : vector<1x16x128xf32> to vector<16x128xf32>
    %c0_2 = arith.constant 0 : index
    %c0_3 = arith.constant 0 : index
    %2 = vector.load %arg2[%c0_2, %c0_3] : memref<16x16xf32, #tpu.memory_space<vmem>>, vector<16x16xf32>
    %c0_4 = arith.constant 0 : index
    %c0_5 = arith.constant 0 : index
    %c0_6 = arith.constant 0 : index
    %3 = vector.load %arg6[%c0_4, %c0_5, %c0_6] : memref<3x1x128xf32, #tpu.memory_space<vmem>>, vector<1x1x128xf32>
    %4 = vector.shape_cast %3 : vector<1x1x128xf32> to vector<1x128xf32>
    %c0_7 = arith.constant 0 : index
    %c0_8 = arith.constant 0 : index
    %c0_9 = arith.constant 0 : index
    %5 = vector.load %arg7[%c0_7, %c0_8, %c0_9] : memref<3x1x128xf32, #tpu.memory_space<vmem>>, vector<1x1x128xf32>
    %6 = vector.shape_cast %5 : vector<1x1x128xf32> to vector<1x128xf32>
    %7 = arith.addf %4, %6 : vector<1x128xf32>
    %8 = vector.shape_cast %7 : vector<1x128xf32> to vector<1x128xf32>
    %9 = vector.broadcast %8 : vector<1x128xf32> to vector<16x128xf32>
    %c1 = arith.constant 1 : index
    %c0_10 = arith.constant 0 : index
    %c0_11 = arith.constant 0 : index
    %10 = vector.load %arg6[%c1, %c0_10, %c0_11] : memref<3x1x128xf32, #tpu.memory_space<vmem>>, vector<1x1x128xf32>
    %11 = vector.shape_cast %10 : vector<1x1x128xf32> to vector<1x128xf32>
    %c1_12 = arith.constant 1 : index
    %c0_13 = arith.constant 0 : index
    %c0_14 = arith.constant 0 : index
    %12 = vector.load %arg7[%c1_12, %c0_13, %c0_14] : memref<3x1x128xf32, #tpu.memory_space<vmem>>, vector<1x1x128xf32>
    %13 = vector.shape_cast %12 : vector<1x1x128xf32> to vector<1x128xf32>
    %14 = arith.addf %11, %13 : vector<1x128xf32>
    %15 = vector.shape_cast %14 : vector<1x128xf32> to vector<1x128xf32>
    %16 = vector.broadcast %15 : vector<1x128xf32> to vector<16x128xf32>
    %c2 = arith.constant 2 : index
    %c0_15 = arith.constant 0 : index
    %c0_16 = arith.constant 0 : index
    %17 = vector.load %arg6[%c2, %c0_15, %c0_16] : memref<3x1x128xf32, #tpu.memory_space<vmem>>, vector<1x1x128xf32>
    %18 = vector.shape_cast %17 : vector<1x1x128xf32> to vector<1x128xf32>
    %19 = vector.shape_cast %18 : vector<1x128xf32> to vector<1x128xf32>
    %20 = vector.broadcast %19 : vector<1x128xf32> to vector<16x128xf32>
    %c2_17 = arith.constant 2 : index
    %c0_18 = arith.constant 0 : index
    %c0_19 = arith.constant 0 : index
    %21 = vector.load %arg7[%c2_17, %c0_18, %c0_19] : memref<3x1x128xf32, #tpu.memory_space<vmem>>, vector<1x1x128xf32>
    %22 = vector.shape_cast %21 : vector<1x1x128xf32> to vector<1x128xf32>
    %23 = vector.shape_cast %22 : vector<1x128xf32> to vector<1x128xf32>
    %24 = vector.broadcast %23 : vector<1x128xf32> to vector<16x128xf32>
    %25 = arith.truncf %1 : vector<16x128xf32> to vector<16x128xbf16>
    %c0_20 = arith.constant 0 : index
    %c0_21 = arith.constant 0 : index
    %c0_22 = arith.constant 0 : index
    %26 = vector.load %arg3[%c0_20, %c0_21, %c0_22] : memref<2x128x128xbf16, #tpu.memory_space<vmem>>, vector<1x128x128xbf16>
    %27 = vector.shape_cast %26 : vector<1x128x128xbf16> to vector<128x128xbf16>
    %cst = arith.constant dense<0.000000e+00> : vector<16x128xf32>
    %28 = tpu.matmul %25, %27, %cst {dimension_numbers = #tpu.dot_dimension_numbers<[1], [0], [0], [1], [0, 0, 1, 1], [], []>} : vector<16x128xbf16>, vector<128x128xbf16>, vector<16x128xf32> -> vector<16x128xf32>
    %cst_23 = arith.constant dense<0.000000e+00> : vector<16x128xf32>
    %29 = tpu.matmul %2, %28, %cst_23 {dimension_numbers = #tpu.dot_dimension_numbers<[1], [0], [0], [1], [0, 0, 1, 1], [], []>} : vector<16x16xf32>, vector<16x128xf32>, vector<16x128xf32> -> vector<16x128xf32>
    %30 = arith.truncf %29 : vector<16x128xf32> to vector<16x128xbf16>
    %c0_24 = arith.constant 0 : index
    %c0_25 = arith.constant 0 : index
    %c0_26 = arith.constant 0 : index
    %31 = vector.load %arg4[%c0_24, %c0_25, %c0_26] : memref<3x128x128xbf16, #tpu.memory_space<vmem>>, vector<1x128x128xbf16>
    %32 = vector.shape_cast %31 : vector<1x128x128xbf16> to vector<128x128xbf16>
    %cst_27 = arith.constant dense<0.000000e+00> : vector<16x128xf32>
    %33 = tpu.matmul %30, %32, %cst_27 {dimension_numbers = #tpu.dot_dimension_numbers<[1], [0], [0], [1], [0, 0, 1, 1], [], []>} : vector<16x128xbf16>, vector<128x128xbf16>, vector<16x128xf32> -> vector<16x128xf32>
    %c1_28 = arith.constant 1 : index
    %c0_29 = arith.constant 0 : index
    %c0_30 = arith.constant 0 : index
    %34 = vector.load %arg4[%c1_28, %c0_29, %c0_30] : memref<3x128x128xbf16, #tpu.memory_space<vmem>>, vector<1x128x128xbf16>
    %35 = vector.shape_cast %34 : vector<1x128x128xbf16> to vector<128x128xbf16>
    %cst_31 = arith.constant dense<0.000000e+00> : vector<16x128xf32>
    %36 = tpu.matmul %30, %35, %cst_31 {dimension_numbers = #tpu.dot_dimension_numbers<[1], [0], [0], [1], [0, 0, 1, 1], [], []>} : vector<16x128xbf16>, vector<128x128xbf16>, vector<16x128xf32> -> vector<16x128xf32>
    %c2_32 = arith.constant 2 : index
    %c0_33 = arith.constant 0 : index
    %c0_34 = arith.constant 0 : index
    %37 = vector.load %arg4[%c2_32, %c0_33, %c0_34] : memref<3x128x128xbf16, #tpu.memory_space<vmem>>, vector<1x128x128xbf16>
    %38 = vector.shape_cast %37 : vector<1x128x128xbf16> to vector<128x128xbf16>
    %cst_35 = arith.constant dense<0.000000e+00> : vector<16x128xf32>
    %39 = tpu.matmul %30, %38, %cst_35 {dimension_numbers = #tpu.dot_dimension_numbers<[1], [0], [0], [1], [0, 0, 1, 1], [], []>} : vector<16x128xbf16>, vector<128x128xbf16>, vector<16x128xf32> -> vector<16x128xf32>
    %c0_36 = arith.constant 0 : index
    %c0_37 = arith.constant 0 : index
    %c0_38 = arith.constant 0 : index
    %40 = vector.load %arg5[%c0_36, %c0_37, %c0_38] : memref<3x128x128xbf16, #tpu.memory_space<vmem>>, vector<1x128x128xbf16>
    %41 = vector.shape_cast %40 : vector<1x128x128xbf16> to vector<128x128xbf16>
    %cst_39 = arith.constant dense<0.000000e+00> : vector<16x128xf32>
    %42 = tpu.matmul %25, %41, %cst_39 {dimension_numbers = #tpu.dot_dimension_numbers<[1], [0], [0], [1], [0, 0, 1, 1], [], []>} : vector<16x128xbf16>, vector<128x128xbf16>, vector<16x128xf32> -> vector<16x128xf32>
    %c1_40 = arith.constant 1 : index
    %c0_41 = arith.constant 0 : index
    %c0_42 = arith.constant 0 : index
    %43 = vector.load %arg5[%c1_40, %c0_41, %c0_42] : memref<3x128x128xbf16, #tpu.memory_space<vmem>>, vector<1x128x128xbf16>
    %44 = vector.shape_cast %43 : vector<1x128x128xbf16> to vector<128x128xbf16>
    %cst_43 = arith.constant dense<0.000000e+00> : vector<16x128xf32>
    %45 = tpu.matmul %25, %44, %cst_43 {dimension_numbers = #tpu.dot_dimension_numbers<[1], [0], [0], [1], [0, 0, 1, 1], [], []>} : vector<16x128xbf16>, vector<128x128xbf16>, vector<16x128xf32> -> vector<16x128xf32>
    %c2_44 = arith.constant 2 : index
    %c0_45 = arith.constant 0 : index
    %c0_46 = arith.constant 0 : index
    %46 = vector.load %arg5[%c2_44, %c0_45, %c0_46] : memref<3x128x128xbf16, #tpu.memory_space<vmem>>, vector<1x128x128xbf16>
    %47 = vector.shape_cast %46 : vector<1x128x128xbf16> to vector<128x128xbf16>
    %cst_47 = arith.constant dense<0.000000e+00> : vector<16x128xf32>
    %48 = tpu.matmul %25, %47, %cst_47 {dimension_numbers = #tpu.dot_dimension_numbers<[1], [0], [0], [1], [0, 0, 1, 1], [], []>} : vector<16x128xbf16>, vector<128x128xbf16>, vector<16x128xf32> -> vector<16x128xf32>
    %49 = arith.addf %33, %42 : vector<16x128xf32>
    %50 = arith.addf %49, %9 : vector<16x128xf32>
    %51 = arith.negf %50 : vector<16x128xf32>
    %52 = math.exp %51 : vector<16x128xf32>
    %cst_48 = arith.constant 1.000000e+00 : f32
    %53 = vector.broadcast %cst_48 : f32 to vector<16x128xf32>
    %54 = arith.addf %53, %52 : vector<16x128xf32>
    %55 = arith.divf %53, %54 : vector<16x128xf32>
    %56 = arith.addf %36, %45 : vector<16x128xf32>
    %57 = arith.addf %56, %16 : vector<16x128xf32>
    %58 = arith.negf %57 : vector<16x128xf32>
    %59 = math.exp %58 : vector<16x128xf32>
    %cst_49 = arith.constant 1.000000e+00 : f32
    %60 = vector.broadcast %cst_49 : f32 to vector<16x128xf32>
    %61 = arith.addf %60, %59 : vector<16x128xf32>
    %62 = arith.divf %60, %61 : vector<16x128xf32>
    %63 = arith.addf %39, %20 : vector<16x128xf32>
    %64 = arith.addf %48, %24 : vector<16x128xf32>
    %65 = arith.mulf %55, %64 : vector<16x128xf32>
    %66 = arith.addf %63, %65 : vector<16x128xf32>
    %67 = math.tanh %66 : vector<16x128xf32>
    %cst_50 = arith.constant 1.000000e+00 : f32
    %68 = vector.broadcast %cst_50 : f32 to vector<16x128xf32>
    %69 = arith.subf %68, %62 : vector<16x128xf32>
    %70 = arith.mulf %69, %67 : vector<16x128xf32>
    %71 = arith.mulf %62, %1 : vector<16x128xf32>
    %72 = arith.addf %70, %71 : vector<16x128xf32>
    %73 = arith.truncf %72 : vector<16x128xf32> to vector<16x128xbf16>
    %c1_51 = arith.constant 1 : index
    %c0_52 = arith.constant 0 : index
    %c0_53 = arith.constant 0 : index
    %74 = vector.load %arg3[%c1_51, %c0_52, %c0_53] : memref<2x128x128xbf16, #tpu.memory_space<vmem>>, vector<1x128x128xbf16>
    %75 = vector.shape_cast %74 : vector<1x128x128xbf16> to vector<128x128xbf16>
    %cst_54 = arith.constant dense<0.000000e+00> : vector<16x128xf32>
    %76 = tpu.matmul %73, %75, %cst_54 {dimension_numbers = #tpu.dot_dimension_numbers<[1], [0], [0], [1], [0, 0, 1, 1], [], []>} : vector<16x128xbf16>, vector<128x128xbf16>, vector<16x128xf32> -> vector<16x128xf32>
    %cst_55 = arith.constant dense<0.000000e+00> : vector<16x128xf32>
    %77 = tpu.matmul %2, %76, %cst_55 {dimension_numbers = #tpu.dot_dimension_numbers<[1], [0], [0], [1], [0, 0, 1, 1], [], []>} : vector<16x16xf32>, vector<16x128xf32>, vector<16x128xf32> -> vector<16x128xf32>
    %78 = arith.truncf %77 : vector<16x128xf32> to vector<16x128xbf16>
    %c0_56 = arith.constant 0 : index
    %c0_57 = arith.constant 0 : index
    %c0_58 = arith.constant 0 : index
    %79 = vector.load %arg4[%c0_56, %c0_57, %c0_58] : memref<3x128x128xbf16, #tpu.memory_space<vmem>>, vector<1x128x128xbf16>
    %80 = vector.shape_cast %79 : vector<1x128x128xbf16> to vector<128x128xbf16>
    %cst_59 = arith.constant dense<0.000000e+00> : vector<16x128xf32>
    %81 = tpu.matmul %78, %80, %cst_59 {dimension_numbers = #tpu.dot_dimension_numbers<[1], [0], [0], [1], [0, 0, 1, 1], [], []>} : vector<16x128xbf16>, vector<128x128xbf16>, vector<16x128xf32> -> vector<16x128xf32>
    %c1_60 = arith.constant 1 : index
    %c0_61 = arith.constant 0 : index
    %c0_62 = arith.constant 0 : index
    %82 = vector.load %arg4[%c1_60, %c0_61, %c0_62] : memref<3x128x128xbf16, #tpu.memory_space<vmem>>, vector<1x128x128xbf16>
    %83 = vector.shape_cast %82 : vector<1x128x128xbf16> to vector<128x128xbf16>
    %cst_63 = arith.constant dense<0.000000e+00> : vector<16x128xf32>
    %84 = tpu.matmul %78, %83, %cst_63 {dimension_numbers = #tpu.dot_dimension_numbers<[1], [0], [0], [1], [0, 0, 1, 1], [], []>} : vector<16x128xbf16>, vector<128x128xbf16>, vector<16x128xf32> -> vector<16x128xf32>
    %c2_64 = arith.constant 2 : index
    %c0_65 = arith.constant 0 : index
    %c0_66 = arith.constant 0 : index
    %85 = vector.load %arg4[%c2_64, %c0_65, %c0_66] : memref<3x128x128xbf16, #tpu.memory_space<vmem>>, vector<1x128x128xbf16>
    %86 = vector.shape_cast %85 : vector<1x128x128xbf16> to vector<128x128xbf16>
    %cst_67 = arith.constant dense<0.000000e+00> : vector<16x128xf32>
    %87 = tpu.matmul %78, %86, %cst_67 {dimension_numbers = #tpu.dot_dimension_numbers<[1], [0], [0], [1], [0, 0, 1, 1], [], []>} : vector<16x128xbf16>, vector<128x128xbf16>, vector<16x128xf32> -> vector<16x128xf32>
    %c0_68 = arith.constant 0 : index
    %c0_69 = arith.constant 0 : index
    %c0_70 = arith.constant 0 : index
    %88 = vector.load %arg5[%c0_68, %c0_69, %c0_70] : memref<3x128x128xbf16, #tpu.memory_space<vmem>>, vector<1x128x128xbf16>
    %89 = vector.shape_cast %88 : vector<1x128x128xbf16> to vector<128x128xbf16>
    %cst_71 = arith.constant dense<0.000000e+00> : vector<16x128xf32>
    %90 = tpu.matmul %73, %89, %cst_71 {dimension_numbers = #tpu.dot_dimension_numbers<[1], [0], [0], [1], [0, 0, 1, 1], [], []>} : vector<16x128xbf16>, vector<128x128xbf16>, vector<16x128xf32> -> vector<16x128xf32>
    %c1_72 = arith.constant 1 : index
    %c0_73 = arith.constant 0 : index
    %c0_74 = arith.constant 0 : index
    %91 = vector.load %arg5[%c1_72, %c0_73, %c0_74] : memref<3x128x128xbf16, #tpu.memory_space<vmem>>, vector<1x128x128xbf16>
    %92 = vector.shape_cast %91 : vector<1x128x128xbf16> to vector<128x128xbf16>
    %cst_75 = arith.constant dense<0.000000e+00> : vector<16x128xf32>
    %93 = tpu.matmul %73, %92, %cst_75 {dimension_numbers = #tpu.dot_dimension_numbers<[1], [0], [0], [1], [0, 0, 1, 1], [], []>} : vector<16x128xbf16>, vector<128x128xbf16>, vector<16x128xf32> -> vector<16x128xf32>
    %c2_76 = arith.constant 2 : index
    %c0_77 = arith.constant 0 : index
    %c0_78 = arith.constant 0 : index
    %94 = vector.load %arg5[%c2_76, %c0_77, %c0_78] : memref<3x128x128xbf16, #tpu.memory_space<vmem>>, vector<1x128x128xbf16>
    %95 = vector.shape_cast %94 : vector<1x128x128xbf16> to vector<128x128xbf16>
    %cst_79 = arith.constant dense<0.000000e+00> : vector<16x128xf32>
    %96 = tpu.matmul %73, %95, %cst_79 {dimension_numbers = #tpu.dot_dimension_numbers<[1], [0], [0], [1], [0, 0, 1, 1], [], []>} : vector<16x128xbf16>, vector<128x128xbf16>, vector<16x128xf32> -> vector<16x128xf32>
    %97 = arith.addf %81, %90 : vector<16x128xf32>
    %98 = arith.addf %97, %9 : vector<16x128xf32>
    %99 = arith.negf %98 : vector<16x128xf32>
    %100 = math.exp %99 : vector<16x128xf32>
    %cst_80 = arith.constant 1.000000e+00 : f32
    %101 = vector.broadcast %cst_80 : f32 to vector<16x128xf32>
    %102 = arith.addf %101, %100 : vector<16x128xf32>
    %103 = arith.divf %101, %102 : vector<16x128xf32>
    %104 = arith.addf %84, %93 : vector<16x128xf32>
    %105 = arith.addf %104, %16 : vector<16x128xf32>
    %106 = arith.negf %105 : vector<16x128xf32>
    %107 = math.exp %106 : vector<16x128xf32>
    %cst_81 = arith.constant 1.000000e+00 : f32
    %108 = vector.broadcast %cst_81 : f32 to vector<16x128xf32>
    %109 = arith.addf %108, %107 : vector<16x128xf32>
    %110 = arith.divf %108, %109 : vector<16x128xf32>
    %111 = arith.addf %87, %20 : vector<16x128xf32>
    %112 = arith.addf %96, %24 : vector<16x128xf32>
    %113 = arith.mulf %103, %112 : vector<16x128xf32>
    %114 = arith.addf %111, %113 : vector<16x128xf32>
    %115 = math.tanh %114 : vector<16x128xf32>
    %cst_82 = arith.constant 1.000000e+00 : f32
    %116 = vector.broadcast %cst_82 : f32 to vector<16x128xf32>
    %117 = arith.subf %116, %110 : vector<16x128xf32>
    %118 = arith.mulf %117, %115 : vector<16x128xf32>
    %119 = arith.mulf %110, %72 : vector<16x128xf32>
    %120 = arith.addf %118, %119 : vector<16x128xf32>
    %c0_83 = arith.constant 0 : index
    %c0_84 = arith.constant 0 : index
    %c0_85 = arith.constant 0 : index
    %121 = vector.load %arg8[%c0_83, %c0_84, %c0_85] : memref<1x16x128xf32, #tpu.memory_space<vmem>>, vector<1x16x128xf32>
    %122 = vector.shape_cast %121 : vector<1x16x128xf32> to vector<16x128xf32>
    %123 = vector.shape_cast %120 : vector<16x128xf32> to vector<1x16x128xf32>
    tpu.vector_store %arg8[%c0_83, %c0_84, %c0_85], %123 {strides = array<i32>} : memref<1x16x128xf32, #tpu.memory_space<vmem>>, vector<1x16x128xf32>,
    return
  }
  func.func @transform_0(%arg0: i32) -> (i32, i32, i32) {
    %c0_i32 = arith.constant 0 : i32
    %c0_i32_0 = arith.constant 0 : i32
    %c0_i32_1 = arith.constant 0 : i32
    return %arg0, %c0_i32, %c0_i32_0 : i32, i32, i32
  }
  func.func @transform_1(%arg0: i32) -> (i32, i32) {
    %c0_i32 = arith.constant 0 : i32
    %c0_i32_0 = arith.constant 0 : i32
    %c0_i32_1 = arith.constant 0 : i32
    return %c0_i32, %c0_i32_0 : i32, i32
  }
  func.func @transform_2(%arg0: i32) -> (i32, i32, i32) {
    %c0_i32 = arith.constant 0 : i32
    %c0_i32_0 = arith.constant 0 : i32
    %c0_i32_1 = arith.constant 0 : i32
    %c0_i32_2 = arith.constant 0 : i32
    return %c0_i32, %c0_i32_0, %c0_i32_1 : i32, i32, i32
  }
  func.func @transform_3(%arg0: i32) -> (i32, i32, i32) {
    %c0_i32 = arith.constant 0 : i32
    %c0_i32_0 = arith.constant 0 : i32
    %c0_i32_1 = arith.constant 0 : i32
    %c0_i32_2 = arith.constant 0 : i32
    return %c0_i32, %c0_i32_0, %c0_i32_1 : i32, i32, i32
  }
  func.func @transform_4(%arg0: i32) -> (i32, i32, i32) {
    %c0_i32 = arith.constant 0 : i32
    %c0_i32_0 = arith.constant 0 : i32
    %c0_i32_1 = arith.constant 0 : i32
    %c0_i32_2 = arith.constant 0 : i32
    return %c0_i32, %c0_i32_0, %c0_i32_1 : i32, i32, i32
  }
  func.func @transform_5(%arg0: i32) -> (i32, i32, i32) {
    %c0_i32 = arith.constant 0 : i32
    %c0_i32_0 = arith.constant 0 : i32
    %c0_i32_1 = arith.constant 0 : i32
    %c0_i32_2 = arith.constant 0 : i32
    return %c0_i32, %c0_i32_0, %c0_i32_1 : i32, i32, i32
  }
  func.func @transform_6(%arg0: i32) -> (i32, i32, i32) {
    %c0_i32 = arith.constant 0 : i32
    %c0_i32_0 = arith.constant 0 : i32
    %c0_i32_1 = arith.constant 0 : i32
    %c0_i32_2 = arith.constant 0 : i32
    return %c0_i32, %c0_i32_0, %c0_i32_1 : i32, i32, i32
  }
  func.func @transform_7(%arg0: i32) -> (i32, i32, i32) {
    %c0_i32 = arith.constant 0 : i32
    %c0_i32_0 = arith.constant 0 : i32
    %c0_i32_1 = arith.constant 0 : i32
    return %arg0, %c0_i32, %c0_i32_0 : i32, i32, i32
  }
}

</mosaic_0001>

<bundles_post_ra>
// kernel: tpu_custom_call.1
= control target key start
LH: loop header
LB: loop body
LE: loop exit
PB: predicated region body
PF: predicated region fallthrough
CT: control target
= control target key end

     0   :  { %s2756_s0 = inlined_call_operand.hbm [shape: f32[2,16,128], index: 0, kind: input, shape index: {}]   ;;  %s2757_s1 = inlined_call_operand.hbm [shape: f32[16,16], index: 1, kind: input, shape index: {}]   ;;  %s2758_s2 = inlined_call_operand.hbm [shape: bf16[2,128,128], index: 2, kind: input, shape index: {}]   ;;  %s2759_s3 = inlined_call_operand.hbm [shape: bf16[3,128,128], index: 3, kind: input, shape index: {}]   ;;  %s2760_s4 = inlined_call_operand.hbm [shape: bf16[3,128,128], index: 4, kind: input, shape index: {}]   ;;  %s2761_s5 = inlined_call_operand.vmem [shape: f32[3,1,128], index: 5, kind: input, shape index: {}]   ;;  %s2762_s6 = inlined_call_operand.hbm [shape: f32[3,1,128], index: 6, kind: input, shape index: {}]   ;;  %s2763_s7 = inlined_call_operand.hbm [shape: f32[2,16,128], index: 7, kind: output, shape index: {}]  }
   0x1   :  { %2766 = sst [smem:[#allocation19_spill]] %s2757_s1 }
   0x2   :  { %12 = vsyncpa [#allocation3], 0 }
   0x3   :  { %14 = vsyncpa [#allocation3 + $0x1], 0 }
   0x4   :  { %15 = vsyncpa [#allocation6], 0 }
   0x5   :  { %16 = vsyncpa [#allocation9], 0 }
   0x6   :  { %17 = vsyncpa [#allocation12], 0 }
   0x7   :  { %18 = vsyncpa [#allocation4], 0 }
   0x8   :  { %20 = vsyncpa [#allocation4 + $0x1], 0  ;;  %s2327_s24 = smov 0   ;;  %s2329_s25 = smov 0  }
   0x9   :  { %s2331_s26 = smov 0   ;;  %s2333_s27 = smov 0  }
   0xa LB: > { %s2767_s1 = sld [smem:[#allocation19_spill]]  ;;  %s2351_s8 = sadd.s32 4294967295, %s2272_s27   ;;  %s2272_s27 = sphi %s2333_s27, %s2782_s27   ;;  %s2268_s26 = sphi %s2331_s26, %s2781_s26   ;;  %s2264_s25 = sphi %s2329_s25, %s2780_s25   ;;  %s2260_s24 = sphi %s2327_s24, %s2779_s24  }
   0xb   : > { %p1508_p0 = scmp.ge.s32.totalorder %s2272_s27, 1  ;;  %p47_p1 = scmp.eq.s32.totalorder %s2351_s8, 0 }
   0xc   : > { %p209_p2 = scmp.lt.s32.totalorder %s2272_s27, 3  ;;  %s2274_s10 = smov [#allocation5]  }
   0xd   : > { %s222_s11 = sshll.u32 %s2274_s10, 4  ;;  %s248_s15 = sshll.u32 %s2759_s3, 4  ;;  %s223_s11 = int_to_ptr.vmem [resolvable:$true] %s222_s11  ;;  %s249_s15 = int_to_ptr.hbm [resolvable:$true] %s248_s15 }
   0xe   : > { %p2356_p3 = pnand %p1508_p0, %p209_p2  ;;  %s2764_s16 = smov 128  }
   0xf   : > { %s2765_s17 = smov 8   ;;  %s2277_s18 = smov [#allocation8]  }
  0x10   : > { %s220_s30 = sshll.u32 %s2767_s1, 4  ;;  %p1891_p4 = pneg %p2356_p3  ;;  %s221_s30 = int_to_ptr.hbm [resolvable:$true] %s220_s30 }
  0x11   : > { %s250_s19 = sshll.u32 %s2277_s18, 4  ;;  %s234_s22 = sshll.u32 %s2758_s2, 4  ;;  %s251_s19 = int_to_ptr.vmem [resolvable:$true] %s250_s19  ;;  %s235_s22 = int_to_ptr.hbm [resolvable:$true] %s234_s22 }
  0x12   : > { %p2365_p6 = pnand %p1891_p4, %p47_p1  ;;  %s2278_s23 = smov 64  }
  0x13   : > { %s2279_s28 = smov 4   ;;  %s262_s13 = sshll.u32 %s2760_s4, 4  ;;  %s263_s13 = int_to_ptr.hbm [resolvable:$true] %s262_s13 }
  0x14   : > { %1894 = dma.hbm_to_vmem [thread:$0]  (!%p2365_p6), %s221_s30, 256, %s223_s11, [#allocation6], %s2764_s16, %s2764_s16, %s2765_s17  }
  0x15   : > { %1900 = dma.hbm_to_vmem [thread:$0]  (!%p2365_p6), %s249_s15, 3072, %s251_s19, [#allocation9], %s2278_s23, %s2278_s23, %s2279_s28  }
  0x16   : > { %s2280_s14 = smov [#allocation7]   ;;  %s2281_s11 = smov [#allocation10]  }
  0x17   : > { %s236_s30 = sshll.u32 %s2280_s14, 4  ;;  %s264_s18 = sshll.u32 %s2281_s11, 4  ;;  %s237_s30 = int_to_ptr.vmem [resolvable:$true] %s236_s30  ;;  %s265_s18 = int_to_ptr.vmem [resolvable:$true] %s264_s18 }
  0x18   : > { %1897 = dma.hbm_to_vmem [thread:$0]  (!%p2365_p6), %s235_s22, 2048, %s237_s30, [#allocation6], %s2278_s23, %s2278_s23, %s2279_s28  }
  0x19   : > { %s279_s20 = sshll.u32 %s2762_s6, 4  ;;  %s2282_s21 = smov [#allocation11]   ;;  %s280_s20 = int_to_ptr.hbm [resolvable:$true] %s279_s20 }
  0x1a   : > { %1903 = dma.hbm_to_vmem [thread:$0]  (!%p2365_p6), %s263_s13, 3072, %s265_s18, [#allocation9], %s2278_s23, %s2278_s23, %s2279_s28  }
  0x1b   : > { %s281_s22 = sshll.u32 %s2282_s21, 4  ;;  %s2283_s29 = smov 16   ;;  %s282_s22 = int_to_ptr.vmem [resolvable:$true] %s281_s22 }
  0x1c   : > { %s2284_s10 = smov 1   ;;  %s1507_s14 = sadd.s32 4294967294, %s2272_s27  }
  0x1d   : > { %1906 = dma.hbm_to_vmem [thread:$0]  (!%p2365_p6), %s280_s20, 48, %s282_s22, [#allocation12], %s2283_s29, %s2283_s29, %s2284_s10  }
  0x1e   : > { %s2396_s30 = sadd.s32 1, %s2272_s27   ;;  %s33_s11 = sadd.s32 1, %s2268_s26 }
  0x1f   : > { %s30_s15 = ssub.s32 %s2272_s27, %s2396_s30  ;;  %p40_p7 = scmp.ne.s32.totalorder %s2268_s26, %s2264_s25 }
  0x20   : > { %p31_p8 = scmp.eq.s32.totalorder %s30_s15, 0  ;;  %p41_p9 = scmp.eq.s32.totalorder %s2272_s27, 0 }
  0x21   : > { %p46_p10 = scmp.ne.s32.totalorder %s2264_s25, %s2260_s24  ;;  %p196_p11 = scmp.eq.s32.totalorder %s2351_s8, 1 }
  0x22   : > { %s2408_s23 = scalar_select %p31_p8, %s2268_s26, %s33_s11  }
  0x23   : > { %p2412_p12 = por %p47_p1, %p46_p10  ;;  %p2416_p13 = por %p196_p11, %p40_p7 }
  0x24   : > { %p202_p0 = scmp.eq.s32.totalorder %s1507_s14, 1  ;;  %p42_p2 = por %p41_p9, %p40_p7 }
  0x25   : > { %s295_s13 = sand.u32 1, %s2268_s26   ;;  %p1920_p6 = scmp.lt.s32.totalorder %s2272_s27, 2 }
  0x26   : > { %p2421_p4 = por %p202_p0, %p46_p10  ;;  %s1515_s19 = sshll.u32 %s295_s13, 4 }
  0x27   : > { %s1801_s20 = sshll.u32 %s2272_s27, 4  ;;  %s299_s11 = scalar_lea.vmem [#allocation2], %s1515_s19 }
  0x28   : > { %s304_s29 = scalar_lea.hbm %s2756_s0, %s1801_s20  ;;  %s307_s15 = sshll.u32 %s299_s11, 4  ;;  %s308_s15 = int_to_ptr.vmem [resolvable:$true] %s307_s15 }
  0x29   : > { %s305_s10 = sshll.u32 %s304_s29, 4  ;;  %p2430_p8 = pnand %p1920_p6, %p42_p2  ;;  %s306_s10 = int_to_ptr.hbm [resolvable:$true] %s305_s10 }
  0x2a   : > { %s296_s16 = scalar_lea.sflag [#allocation3], %s295_s13  ;;  %s2164_s17 = sshra.s32 %s306_s10, 4  ;;  %s2165_s17 = int_to_ptr.hbm [resolvable:$true] %s2164_s17 }
  0x2b   : > { %s2166_s1 = scalar_lea.hbm %s2165_s17, 16  ;;  %p2168_p9 = pneg %p2430_p8 }
  0x2c   : > { %p2167_p7 = scmp.ne.s32.totalorder %s2165_s17, %s2166_s1  ;;  %s2171_s19 = scalar_lea.hbm %s2756_s0, 32 }
  0x2d   : > { %p2172_p0 = scmp.lt.s32.totalorder %s2165_s17, %s2756_s0  ;;  %p2173_p2 = scmp.lt.s32.totalorder %s2171_s19, %s2166_s1 }
  0x2e   : > { %p2169_p10 = pnand %p2168_p9, %p2167_p7 }
  0x2f   : > { %p2174_p6 = por %p2173_p2, %p2172_p0 }
  0x30   : > { %p2170_p11 = pneg %p2169_p10 }
  0x32   : > { %p2175_p5 = pnand %p2174_p6, %p2170_p11 }
  0x34   : > { %2178 = shalt.err (!%p2175_p5)
}
  0x35   : > { %s2774_s13 = smov 8   ;;  %s2775_s11 = smov 128  }
  0x36   : > { %1910 = dma.hbm_to_vmem [thread:$0]  (!%p2430_p8), %s306_s10, 256, %s308_s15, %s296_s16, %s2775_s11, %s2775_s11, %s2774_s13  }
  0x37   : > { %319 = sbr.rel (%p2356_p3) target bundleno = 1013 (0x3f5), region = 48  ;;  %s2450_s20 = sand.u32 (!%p2356_p3), 1, %s2264_s25  }
  0x38   : > { %s1519_s1 = sshll.u32 (!%p2356_p3), %s2450_s20, 4  ;;  %s322_s17 = scalar_lea.sflag (!%p2356_p3), [#allocation3], %s2450_s20 }
  0x39   : > { %s325_s21 = scalar_lea.vmem (!%p2356_p3), [#allocation2], %s1519_s1 }
  0x3c   : > { %2239 = dma.done.wait (%p2412_p12), %s322_s17, 256  }
  0x3d   : > { %2241 = vsyncadd (%p2412_p12), %s322_s17, 4294967040 }
  0x3e   : > { %2243 = dma.done.wait (%p47_p1), [#allocation6], 2304  }
  0x3f   : > { %2245 = vsyncadd (%p47_p1), [#allocation6], 4294964992 }
  0x40   : > { %2247 = dma.done.wait (%p47_p1), [#allocation9], 6144  }
  0x41   : > { %2249 = vsyncadd (%p47_p1), [#allocation9], 4294961152 }
  0x42   : > { %2251 = dma.done.wait (%p47_p1), [#allocation12], 48  }
  0x43   : > { %2253 = vsyncadd (%p47_p1), [#allocation12], 4294967248  ;;  %v1809_v0 = vld [vmem:[#allocation7 + $0x38] sm:$0xff]  ;;  %v1808_v1 = vld [vmem:[#allocation7 + $0x30] sm:$0xff]  ;;  %vm489_vm0 = vcmask 130048   ;;  %s1866_s19 = sshll.u32 %s2351_s8, 4 }
  0x44   : > { %475 = vmatpush.bf16.msra.mxu0 %v1809_v0  ;;  %v1807_v2 = vld [vmem:[#allocation7 + $0x28] sm:$0xff]  ;;  %v1806_v3 = vld [vmem:[#allocation7 + $0x20] sm:$0xff]  ;;  %v1805_v4 = vld [vmem:[#allocation7 + $0x18] sm:$0xff]  ;;  %s1382_s13 = scalar_lea.hbm %s2763_s7, %s1866_s19  ;;  %s381_s11 = scalar_lea.vmem [#allocation13], %s1519_s1 }
  0x45   : > { %v1804_v5 = vld [vmem:[#allocation7 + $0x10] sm:$0xff]  ;;  %v1803_v6 = vld [vmem:[#allocation7 + $0x8] sm:$0xff]  ;;  %v1802_v7 = vld [vmem:[#allocation7] sm:$0xff]  ;;  %s1383_s17 = sshll.u32 %s381_s11, 4  ;;  %s1371_s8 = scalar_lea.sflag [#allocation4], %s2450_s20  ;;  %s1384_s17 = int_to_ptr.vmem [resolvable:$true] %s1383_s17 }
  0x46   : > { %v2472_v8 = vld [vmem:[%s325_s21] sm:$0xff]  ;;  %v2474_v9 = vld [vmem:[%s325_s21 + $0x8] sm:$0xff]  ;;  %s1385_s21 = sshll.u32 %s1382_s13, 4  ;;  %s2214_s10 = scalar_lea.hbm %s2763_s7, 32  ;;  %s1386_s21 = int_to_ptr.hbm [resolvable:$true] %s1385_s21 }
  0x47   : > { %v2478_v10 = vpack.c.bf16 %v2474_v9, %v2472_v8  ;;  %v2481_v11 = vld [vmem:[#allocation10 + $0x38] sm:$0xff]  ;;  %v2486_v13 = vld [vmem:[#allocation10 + $0x30] sm:$0xff]  ;;  %v2494_v16 = vld [vmem:[#allocation10 + $0x28] sm:$0xff]  ;;  %s2208_s9 = sshra.s32 %s1386_s21, 4  ;;  %s2209_s9 = int_to_ptr.hbm [resolvable:$true] %s2208_s9 }
  0x48   : > { %476 = vmatpush.bf16.msra.mxu0 %v1808_v1  ;;  %v2483_v12 = vld [vmem:[#allocation10 + $0x78] sm:$0xff]  ;;  %634 = vmatpush.bf16.msra.mxu2 %v2481_v11  ;;  %v2489_v14 = vld [vmem:[#allocation10 + $0x70] sm:$0xff]  ;;  %v2500_v18 = vld [vmem:[#allocation10 + $0x68] sm:$0xff]  ;;  %s2210_s16 = scalar_lea.hbm %s2209_s9, 16  ;;  %p2215_p12 = scmp.lt.s32.totalorder %s2209_s9, %s2763_s7 }
  0x49   : > { %713 = vmatpush.bf16.msra.mxu3 %v2483_v12  ;;  %v2491_v15 = vld [vmem:[#allocation8 + $0x78] sm:$0xff]  ;;  %v2497_v17 = vld [vmem:[#allocation8 + $0x70] sm:$0xff]  ;;  %v2503_v19 = vld [vmem:[#allocation10 + $0x20] sm:$0xff]  ;;  %p2211_p1 = scmp.ne.s32.totalorder %s2209_s9, %s2210_s16  ;;  %p2216_p8 = scmp.lt.s32.totalorder %s2214_s10, %s2210_s16 }
  0x4a   : > { %v2506_v20 = vld [vmem:[#allocation8 + $0x68] sm:$0xff]  ;;  %v2509_v21 = vld [vmem:[#allocation10 + $0x60] sm:$0xff]  ;;  %v2512_v23 = vld [vmem:[#allocation10 + $0x18] sm:$0xff] }
  0x4b   : > { %v2515_v24 = vld [vmem:[#allocation8 + $0x60] sm:$0xff]  ;;  %v2518_v25 = vld [vmem:[#allocation10 + $0x58] sm:$0xff]  ;;  %v2521_v26 = vld [vmem:[#allocation10 + $0x10] sm:$0xff]  ;;  %p2212_p3 = pnand %p2211_p1, %p2416_p13  ;;  %p2217_p7 = por %p2216_p8, %p2215_p12 }
  0x4c   : > { %477 = vmatpush.bf16.msra.mxu0 %v1807_v2  ;;  %635 = vmatpush.bf16.msra.mxu2 %v2486_v13  ;;  %v2524_v27 = vld [vmem:[#allocation8 + $0x58] sm:$0xff]  ;;  %v2527_v28 = vld [vmem:[#allocation10 + $0x50] sm:$0xff]  ;;  %v2534_v32 = vld [vmem:[#allocation10 + $0x8] sm:$0xff] }
  0x4d   : > { %714 = vmatpush.bf16.msra.mxu3 %v2489_v14  ;;  %v2529_v30 = vld [vmem:[#allocation5] sm:$0xff]  ;;  %v2531_v31 = vld [vmem:[#allocation8 + $0x38] sm:$0xff]  ;;  %v2538_v33 = vld [vmem:[#allocation10 + $0x48] sm:$0xff]  ;;  %p2213_p5 = pneg %p2212_p3 }
  0x4e   : > { %v2543_v34 = vld [vmem:[#allocation8 + $0x30] sm:$0xff]  ;;  %v2546_v35 = vld [vmem:[#allocation10] sm:$0xff]  ;;  %v2548_v36 = vld [vmem:[#allocation8 + $0xb8] sm:$0xff] }
  0x4f   : > { %v2551_v37 = vld [vmem:[#allocation10 + $0x40] sm:$0xff]  ;;  %v2553_v38 = vld [vmem:[#allocation10 + $0xb8] sm:$0xff]  ;;  %v2558_v40 = vld [vmem:[#allocation8 + $0x28] sm:$0xff]  ;;  %p2218_p9 = pnand %p2217_p7, %p2213_p5 }
  0x50   : > { %478 = vmatpush.bf16.msra.mxu0 %v1806_v3  ;;  %636 = vmatpush.bf16.msra.mxu2 %v2494_v16  ;;  %v2555_v39 = vld [vmem:[#allocation5 + $0x8] sm:$0xff]  ;;  %v2562_v41 = vld [vmem:[#allocation8 + $0xb0] sm:$0xff]  ;;  %v2569_v42 = vld [vmem:[#allocation8 + $0x20] sm:$0xff] }
  0x51   : > { %715 = vmatpush.bf16.msra.mxu3 %v2500_v18  ;;  %v2574_v43 = vld [vmem:[#allocation8 + $0xa8] sm:$0xff]  ;;  %v2577_v44 = vld [vmem:[#allocation8 + $0x18] sm:$0xff]  ;;  %v2580_v45 = vld [vmem:[#allocation8 + $0xa0] sm:$0xff] }
  0x52   : > { %v1829_v46 = vld [vmem:[#allocation8 + $0x98] sm:$0xff]  ;;  %v2584_v47 = vld [vmem:[#allocation8 + $0x10] sm:$0xff]  ;;  %v2590_v51 = vld [vmem:[#allocation8 + $0x8] sm:$0xff] }
  0x53   : > { %v2586_v48 = vld [vmem:[#allocation8 + $0x50] sm:$0xff]  ;;  %v2592_v52 = vld [vmem:[#allocation8 + $0x48] sm:$0xff]  ;;  %v2596_v55 = vld [vmem:[#allocation8] sm:$0xff] }
  0x54   : > { %479 = vmatpush.bf16.msra.mxu0 %v1805_v4  ;;  %637 = vmatpush.bf16.msra.mxu2 %v2503_v19  ;;  %v1828_v49 = vld [vmem:[#allocation8 + $0x90] sm:$0xff]  ;;  %v1827_v53 = vld [vmem:[#allocation8 + $0x88] sm:$0xff]  ;;  %v2598_v56 = vld [vmem:[#allocation8 + $0x40] sm:$0xff] }
  0x55   : > { %716 = vmatpush.bf16.msra.mxu3 %v2509_v21  ;;  %v1856_v50 = vld [vmem:[#allocation10 + $0xb0] sm:$0xff]  ;;  %v1855_v54 = vld [vmem:[#allocation10 + $0xa8] sm:$0xff]  ;;  %v1826_v57 = vld [vmem:[#allocation8 + $0x80] sm:$0xff] }
  0x56   : > { %v1854_v58 = vld [vmem:[#allocation10 + $0xa0] sm:$0xff]  ;;  %v1853_v59 = vld [vmem:[#allocation10 + $0x98] sm:$0xff]  ;;  %v1852_v60 = vld [vmem:[#allocation10 + $0x90] sm:$0xff] }
  0x57   : > { %v1851_v61 = vld [vmem:[#allocation10 + $0x88] sm:$0xff]  ;;  %v1850_v62 = vld [vmem:[#allocation10 + $0x80] sm:$0xff]  ;;  %v386_v2 = vld [vmem:[%s2761_s5] sm:$0x1] }
  0x58   : > { %480 = vmatpush.bf16.msra.mxu0 %v1804_v5  ;;  %638 = vmatpush.bf16.msra.mxu2 %v2512_v23  ;;  %v387_v3 = vld [vmem:[#allocation11] sm:$0x1]  ;;  %v1526_v4 = vld [vmem:[%s2761_s5 + $0x1] sm:$0x1]  ;;  %v395_v5 = vld [vmem:[#allocation11 + $0x1] sm:$0x1] }
  0x59   : > { %717 = vmatpush.bf16.msra.mxu3 %v2518_v25 }
  0x5c   : > { %481 = vmatpush.bf16.msra.mxu0 %v1803_v6  ;;  %639 = vmatpush.bf16.msra.mxu2 %v2521_v26  ;;  %v388_v6 = vadd.f32 %v387_v3, %v386_v2 }
  0x5d   : > { %718 = vmatpush.bf16.msra.mxu3 %v2527_v28 }
  0x60   : > { %482 = vmatpush.bf16.msra.mxu0 %v1802_v7  ;;  %640 = vmatpush.bf16.msra.mxu2 %v2534_v32  ;;  %v396_v7 = vadd.f32 %v1526_v4, %v395_v5 }
  0x61   : > { %719 = vmatpush.bf16.msra.mxu3 %v2538_v33 }
  0x63   : > { %483 = vmatmul.bf16.vlgmr.msra.gmra.mxu0 %v2478_v10 }
  0x64   : > { %894 = vmatpush.bf16.msrb.mxu0 %v2491_v15  ;;  %641 = vmatpush.bf16.msra.mxu2 %v2546_v35 }
  0x65   : > { %720 = vmatpush.bf16.msra.mxu3 %v2551_v37 }
  0x67   : > { %642 = vmatmul.bf16.vlgmr.msra.gmra.mxu2 %v2478_v10 }
  0x68   : > { %895 = vmatpush.bf16.msrb.mxu0 %v2497_v17  ;;  %996 = vmatpush.bf16.msrb.mxu2 %v2548_v36 }
  0x69   : > { %1058 = vmatpush.bf16.msrb.mxu3 %v2553_v38 }
  0x6a   : > { %721 = vmatmul.bf16.vlgmr.msra.gmra.mxu3 %v2478_v10 }
  0x6c   : > { %896 = vmatpush.bf16.msrb.mxu0 %v2506_v20  ;;  %997 = vmatpush.bf16.msrb.mxu2 %v2562_v41 }
  0x6d   : > { %1059 = vmatpush.bf16.msrb.mxu3 %v1856_v50 }
  0x70   : > { %897 = vmatpush.bf16.msrb.mxu0 %v2515_v24  ;;  %998 = vmatpush.bf16.msrb.mxu2 %v2574_v43 }
  0x71   : > { %1060 = vmatpush.bf16.msrb.mxu3 %v1855_v54 }
  0x74   : > { %898 = vmatpush.bf16.msrb.mxu0 %v2524_v27  ;;  %999 = vmatpush.bf16.msrb.mxu2 %v2580_v45 }
  0x75   : > { %1061 = vmatpush.bf16.msrb.mxu3 %v1854_v58 }
  0x78   : > { %1000 = vmatpush.bf16.msrb.mxu2 %v1829_v46  ;;  %899 = vmatpush.bf16.msrb.mxu0 %v2586_v48 }
  0x79   : > { %1062 = vmatpush.bf16.msrb.mxu3 %v1853_v59 }
  0x7c   : > { %1001 = vmatpush.bf16.msrb.mxu2 %v1828_v49  ;;  %900 = vmatpush.bf16.msrb.mxu0 %v2592_v52 }
  0x7d   : > { %1063 = vmatpush.bf16.msrb.mxu3 %v1852_v60 }
  0x80   : > { %1002 = vmatpush.bf16.msrb.mxu2 %v1827_v53  ;;  %901 = vmatpush.bf16.msrb.mxu0 %v2598_v56 }
  0x81   : > { %1064 = vmatpush.bf16.msrb.mxu3 %v1851_v61 }
  0x84   : > { %1003 = vmatpush.bf16.msrb.mxu2 %v1826_v57 }
  0x85   : > { %1065 = vmatpush.bf16.msrb.mxu3 %v1850_v62 }
  0x88   : > { %1190 = vmatpush.bf16.msra.mxu2 %v2481_v11  ;;  %1066 = vmatmul.bf16.vlgmr.msrb.gmra.mxu3 %v2478_v10  ;;  %v1865_v11 = vld [vmem:[#allocation7 + $0x78] sm:$0xff] }
  0x89   : > { %1204 = vmatpush.bf16.msra.mxu3 %v2483_v12 }
  0x8c   : > { %1191 = vmatpush.bf16.msra.mxu2 %v2486_v13  ;;  %v2630_v13 = vperm.slane %v388_v6, 0  ;;  %v2645_v6 = vld [vmem:[#allocation11 + $0x2] ss:$0 sm:$0xff] }
  0x8d   : > { %1205 = vmatpush.bf16.msra.mxu3 %v2489_v14  ;;  %v2632_v14 = vperm.slane %v396_v7, 0 }
  0x90   : > { %1192 = vmatpush.bf16.msra.mxu2 %v2494_v16 }
  0x91   : > { %1206 = vmatpush.bf16.msra.mxu3 %v2500_v18 }
  0x94   : > { %1193 = vmatpush.bf16.msra.mxu2 %v2503_v19  ;;  %v1864_v19 = vld [vmem:[#allocation7 + $0x70] sm:$0xff] }
  0x95   : > { %1207 = vmatpush.bf16.msra.mxu3 %v2509_v21 }
  0x98   : > { %1194 = vmatpush.bf16.msra.mxu2 %v2512_v23 }
  0x99   : > { %1208 = vmatpush.bf16.msra.mxu3 %v2518_v25 }
  0x9c   : > { %1195 = vmatpush.bf16.msra.mxu2 %v2521_v26  ;;  %v1863_v26 = vld [vmem:[#allocation7 + $0x68] sm:$0xff] }
  0x9d   : > { %1209 = vmatpush.bf16.msra.mxu3 %v2527_v28 }
  0xa0   : > { %1196 = vmatpush.bf16.msra.mxu2 %v2534_v32 }
  0xa1   : > { %1210 = vmatpush.bf16.msra.mxu3 %v2538_v33 }
  0xa4   : > { %1197 = vmatpush.bf16.msra.mxu2 %v2546_v35 }
  0xa5   : > { %1211 = vmatpush.bf16.msra.mxu3 %v2551_v37  ;;  %v1862_v37 = vld [vmem:[#allocation7 + $0x60] sm:$0xff] }
  0xa9   : > { %1340 = vmatpush.bf16.msrb.mxu3 %v2553_v38 }
  0xad   : > { %1341 = vmatpush.bf16.msrb.mxu3 %v1856_v50 }
  0xb1   : > { %1342 = vmatpush.bf16.msrb.mxu3 %v1855_v54 }
  0xb5   : > { %1343 = vmatpush.bf16.msrb.mxu3 %v1854_v58  ;;  %v1860_v58 = vld [vmem:[#allocation7 + $0x50] sm:$0xff] }
  0xb9   : > { %1344 = vmatpush.bf16.msrb.mxu3 %v1853_v59 }
  0xbd   : > { %1345 = vmatpush.bf16.msrb.mxu3 %v1852_v60  ;;  %v1859_v60 = vld [vmem:[#allocation7 + $0x48] sm:$0xff] }
  0xc1   : > { %1346 = vmatpush.bf16.msrb.mxu3 %v1851_v61 }
  0xc5   : > { %1347 = vmatpush.bf16.msrb.mxu3 %v1850_v62 }
  0xe0   : > { %v484_v22 = vpop.f32.mrf.mxu0 }
  0xe8   : > { %v486_v29 = vpop.f32.mrf.mxu0 }
  0xe9   : > { %510 = vmatpush.msra.mxu1 %v486_v29 }
  0xea   : > { %v643_v12 = vpop.f32.mrf.mxu2 }
  0xeb   : > { %511 = vmatpush.msra.mxu1 %v484_v22 }
  0xec   : > { %1560 = vmatmul.msk.f32.vlgmr.msra.gmra.mxu1 %vm489_vm0, %v2529_v30 }
  0xed   : > { %792 = vmatpush.bf16.msrb.mxu1 %v2531_v31  ;;  %v722_v10 = vpop.f32.mrf.mxu3 }
  0xf1   : > { %793 = vmatpush.bf16.msrb.mxu1 %v2543_v34 }
  0xf2   : > { %v645_v33 = vpop.f32.mrf.mxu2 }
  0xf4   : > { %1561 = vmatmul.msk.f32.gmra.mxu1 %vm489_vm0, %v2555_v39 }
  0xf5   : > { %794 = vmatpush.bf16.msrb.mxu1 %v2558_v40  ;;  %v724_v32 = vpop.f32.mrf.mxu3 }
  0xf9   : > { %795 = vmatpush.bf16.msrb.mxu1 %v2569_v42 }
  0xfd   : > { %796 = vmatpush.bf16.msrb.mxu1 %v2577_v44 }
 0x101   : > { %797 = vmatpush.bf16.msrb.mxu1 %v2584_v47 }
 0x105   : > { %798 = vmatpush.bf16.msrb.mxu1 %v2590_v51 }
 0x109   : > { %799 = vmatpush.bf16.msrb.mxu1 %v2596_v55 }
 0x10b   : > { %v1067_v4 = vpop.f32.mrf.mxu3 }
 0x10d   : > { %1152 = vmatpush.bf16.msra.mxu1 %v1865_v11 }
 0x111   : > { %1153 = vmatpush.bf16.msra.mxu1 %v1864_v19 }
 0x115   : > { %1154 = vmatpush.bf16.msra.mxu1 %v1863_v26  ;;  %v2655_v26 = vld [vmem:[%s2761_s5 + $0x2] ss:$0 sm:$0xff] }
 0x119   : > { %1155 = vmatpush.bf16.msra.mxu1 %v1862_v37 }
 0x169   : > { %v513_v63 = vpop.f32.mrf.mxu1 }
 0x171   : > { %v516_v0 = vpop.f32.mrf.mxu1 }
 0x172   : > { %v519_v1 = vpack.c.bf16 %v516_v0, %v513_v63  ;;  %v1858_v0 = vld [vmem:[#allocation7 + $0x40] sm:$0xff] }
 0x174   : > { %800 = vmatmul.bf16.vlgmr.msrb.gmra.mxu1 %v519_v1  ;;  %902 = vmatmul.bf16.vlgmr.msrb.gmra.mxu0 %v519_v1 }
 0x175   : > { %1004 = vmatmul.bf16.vlgmr.msrb.gmra.mxu2 %v519_v1 }
 0x176   : > { %1326 = vmatpush.bf16.msrb.mxu2 %v2548_v36 }
 0x17a   : > { %1327 = vmatpush.bf16.msrb.mxu2 %v2562_v41 }
 0x17e   : > { %1328 = vmatpush.bf16.msrb.mxu2 %v2574_v43 }
 0x182   : > { %1329 = vmatpush.bf16.msrb.mxu2 %v2580_v45 }
 0x186   : > { %1330 = vmatpush.bf16.msrb.mxu2 %v1829_v46  ;;  %v1861_v46 = vld [vmem:[#allocation7 + $0x58] sm:$0xff] }
 0x187   : > { %1156 = vmatpush.bf16.msra.mxu1 %v1861_v46 }
 0x18a   : > { %1331 = vmatpush.bf16.msrb.mxu2 %v1828_v49 }
 0x18b   : > { %1157 = vmatpush.bf16.msra.mxu1 %v1860_v58 }
 0x18e   : > { %1332 = vmatpush.bf16.msrb.mxu2 %v1827_v53 }
 0x18f   : > { %1158 = vmatpush.bf16.msra.mxu1 %v1859_v60 }
 0x192   : > { %1333 = vmatpush.bf16.msrb.mxu2 %v1826_v57 }
 0x193   : > { %1159 = vmatpush.bf16.msra.mxu1 %v1858_v0 }
 0x197   : > { %1218 = vmatpush.bf16.msrb.mxu1 %v2531_v31 }
 0x19b   : > { %1219 = vmatpush.bf16.msrb.mxu1 %v2543_v34 }
 0x19f   : > { %1220 = vmatpush.bf16.msrb.mxu1 %v2558_v40 }
 0x1a3   : > { %1221 = vmatpush.bf16.msrb.mxu1 %v2569_v42 }
 0x1a7   : > { %1222 = vmatpush.bf16.msrb.mxu1 %v2577_v44 }
 0x1ab   : > { %1223 = vmatpush.bf16.msrb.mxu1 %v2584_v47 }
 0x1af   : > { %1224 = vmatpush.bf16.msrb.mxu1 %v2590_v51 }
 0x1b3   : > { %1225 = vmatpush.bf16.msrb.mxu1 %v2596_v55 }
 0x1f1   : > { %v801_v16 = vpop.f32.mrf.mxu1  ;;  %v903_v18 = vpop.f32.mrf.mxu0 }
 0x1f2   : > { %v802_v21 = vadd.f32 %v801_v16, %v643_v12  ;;  %v904_v22 = vadd.f32 %v903_v18, %v722_v10 }
 0x1f4   : > { %v806_v23 = vadd.f32 %v802_v21, %v2630_v13  ;;  %v908_v25 = vadd.f32 %v904_v22, %v2632_v14  ;;  %v1068_v21 = vadd.f32 %v2645_v6, %v1067_v4 }
 0x1f6   : > { %v1658_v28 = vmul.f32 -1.442695, %v806_v23  ;;  %v1692_v29 = vmul.f32 -1.442695, %v908_v25 }
 0x1f8   : > { %1974 = vpow2.f32 %v1658_v28  ;;  %v1005_v18 = vpop.f32.mrf.mxu2 }
 0x1f9   : > { %1976 = vpow2.f32 %v1692_v29  ;;  %v803_v35 = vpop.f32.mrf.mxu1  ;;  %v905_v36 = vpop.f32.mrf.mxu0 }
 0x1fa   : > { %v804_v38 = vadd.f32 %v803_v35, %v645_v33  ;;  %v906_v41 = vadd.f32 %v905_v36, %v724_v32 }
 0x1fc   : > { %v807_v43 = vadd.f32 %v804_v38, %v2630_v13  ;;  %v909_v45 = vadd.f32 %v906_v41, %v2632_v14  ;;  %v1069_v41 = vpop.f32.mrf.mxu3 }
 0x1fe   : > { %v1975_v49 = vpop.eup %1974  ;;  %v1659_v50 = vmul.f32 -1.442695, %v807_v43  ;;  %v1693_v57 = vmul.f32 -1.442695, %v909_v45  ;;  %v1006_v43 = vadd.f32 %v2655_v26, %v1005_v18 }
 0x1ff   : > { %v1977_v53 = vpop.eup %1976  ;;  %v814_v54 = vadd.f32 1.0, %v1975_v49 }
 0x200   : > { %v2638_v59 = vadd.f32 1.0, %v1977_v53  ;;  %1978 = vpow2.f32 %v1659_v50  ;;  %v1070_v53 = vadd.f32 %v2645_v6, %v1069_v41 }
 0x201   : > { %1980 = vrcp.f32 %v814_v54  ;;  %v827_v11 = vand.u32 2147483648, %v814_v54  ;;  %v825_v16 = vand.u32 2147483647, %v814_v54  ;;  %vm821_vm2 = vweird.f32 %v814_v54 }
 0x202   : > { %1982 = vrcp.f32 %v2638_v59  ;;  %vm923_vm9 = vweird.f32 %v2638_v59  ;;  %v929_v40 = vand.u32 2147483648, %v2638_v59 }
 0x203   : > { %1984 = vpow2.f32 %v1693_v57  ;;  %v828_v25 = vor.u32 1.1754944e-38, %v827_v11  ;;  %vm826_vm4 = vcmp.eq.f32.partialorder %v825_v16, 8.507059e+37  ;;  %v1007_v57 = vpop.f32.mrf.mxu2 }
 0x204   : > { %v930_v42 = vor.u32 1.1754944e-38, %v929_v40 }
 0x206   : > { %v1979_v61 = vpop.eup %1978 }
 0x207   : > { %v1981_v62 = vpop.eup %1980  ;;  %v815_v63 = vadd.f32 1.0, %v1979_v61 }
 0x208   : > { %v2641_v1 = vpop.eup %1982  ;;  %v817_v2 = vmul.f32 %v1981_v62, %v814_v54  ;;  %vm822_vm1 = vweird.f32 %v1981_v62 }
 0x209   : > { %v1985_v3 = vpop.eup %1984  ;;  %1986 = vrcp.f32 %v815_v63  ;;  %v919_v10 = vmul.f32 %v2641_v1, %v2638_v59  ;;  %vm823_vm3 = vmor %vm821_vm2, %vm822_vm1  ;;  %v842_v38 = vand.u32 2147483648, %v815_v63  ;;  %v840_v46 = vand.u32 2147483647, %v815_v63 }
 0x20a   : > { %v2643_v5 = vadd.f32 1.0, %v1985_v3  ;;  %v818_v7 = vsub.f32 1.0, %v817_v2  ;;  %vm836_vm6 = vweird.f32 %v815_v63  ;;  %vm924_vm8 = vweird.f32 %v2641_v1 }
 0x20b   : > { %v920_v23 = vsub.f32 1.0, %v919_v10  ;;  %v843_v58 = vor.u32 1.1754944e-38, %v842_v38  ;;  %vm841_vm10 = vcmp.eq.f32.partialorder %v840_v46, 8.507059e+37  ;;  %v1008_v2 = vadd.f32 %v2655_v26, %v1007_v57  ;;  %vm925_vm12 = vmor %vm923_vm9, %vm924_vm8 }
 0x20c   : > { %1988 = vrcp.f32 %v2643_v5  ;;  %v819_v12 = vmul.f32 %v1981_v62, %v818_v7  ;;  %v944_v4 = vand.u32 2147483648, %v2643_v5  ;;  %vm938_vm13 = vweird.f32 %v2643_v5 }
 0x20d   : > { %v921_v36 = vmul.f32 %v2641_v1, %v920_v23  ;;  %v942_v10 = vand.u32 2147483647, %v2643_v5 }
 0x20e   : > { %v820_v19 = vadd.f32 %v1981_v62, %v819_v12  ;;  %v945_v16 = vor.u32 1.1754944e-38, %v944_v4 }
 0x20f   : > { %v1987_v22 = vpop.eup %1986  ;;  %v922_v60 = vadd.f32 %v2641_v1, %v921_v36  ;;  %vm943_vm1 = vcmp.eq.f32.partialorder %v942_v10, 8.507059e+37 }
 0x210   : > { %v824_v28 = vsel %vm823_vm3, %v1981_v62, %v820_v19  ;;  %v832_v29 = vmul.f32 %v1987_v22, %v815_v63  ;;  %vm837_vm5 = vweird.f32 %v1987_v22  ;;  %v927_v63 = vand.u32 2147483647, %v2638_v59 }
 0x211   : > { %v829_v31 = vsel %vm826_vm4, %v828_v25, %v824_v28  ;;  %vm838_vm7 = vmor %vm836_vm6, %vm837_vm5  ;;  %v926_v7 = vsel %vm925_vm12, %v2641_v1, %v922_v60 }
 0x212   : > { %v1989_v32 = vpop.eup %1988  ;;  %v1072_v33 = vmul.f32 %v1068_v21, %v829_v31  ;;  %v833_v35 = vsub.f32 1.0, %v832_v29  ;;  %vm928_vm15 = vcmp.eq.f32.partialorder %v927_v63, 8.507059e+37 }
 0x213   : > { %v934_v37 = vmul.f32 %v1989_v32, %v2643_v5  ;;  %vm939_vm11 = vweird.f32 %v1989_v32  ;;  %v931_v12 = vsel %vm928_vm15, %v930_v42, %v926_v7 }
 0x214   : > { %v834_v45 = vmul.f32 %v1987_v22, %v833_v35  ;;  %v1074_v50 = vadd.f32 %v1072_v33, %v1006_v43  ;;  %vm940_vm14 = vmor %vm938_vm13, %vm939_vm11  ;;  %v1078_v21 = vsub.f32 1.0, %v931_v12  ;;  %v1082_v25 = vmul.f32 %v931_v12, %v2472_v8 }
 0x215   : > { %v935_v49 = vsub.f32 1.0, %v934_v37 }
 0x216   : > { %v835_v34 = vadd.f32 %v1987_v22, %v834_v45  ;;  %1990 = vtanh.f32 %v1074_v50 }
 0x217   : > { %v936_v54 = vmul.f32 %v1989_v32, %v935_v49 }
 0x218   : > { %v839_v61 = vsel %vm838_vm7, %v1987_v22, %v835_v34 }
 0x219   : > { %v844_v62 = vsel %vm841_vm10, %v843_v58, %v839_v61  ;;  %v937_v0 = vadd.f32 %v1989_v32, %v936_v54 }
 0x21a   : > { %v1073_v3 = vmul.f32 %v1070_v53, %v844_v62 }
 0x21b   : > { %v941_v59 = vsel %vm940_vm14, %v1989_v32, %v937_v0 }
 0x21c   : > { %v1075_v11 = vadd.f32 %v1073_v3, %v1008_v2  ;;  %v1991_v18 = vpop.eup %1990  ;;  %v946_v19 = vsel %vm943_vm1, %v945_v16, %v941_v59 }
 0x21d   : > { %v1079_v22 = vsub.f32 1.0, %v946_v19  ;;  %v1080_v1 = vmul.f32 %v1991_v18, %v1078_v21  ;;  %v1083_v44 = vmul.f32 %v946_v19, %v2474_v9 }
 0x21e   : > { %1992 = vtanh.f32 %v1075_v11 }
 0x21f   : > { %v2679_v28 = vadd.f32 %v1082_v25, %v1080_v1 }
 0x224   : > { %v1993_v23 = vpop.eup %1992 }
 0x225   : > { %v1081_v5 = vmul.f32 %v1993_v23, %v1079_v22 }
 0x227   : > { %v2681_v29 = vadd.f32 %v1083_v44, %v1081_v5 }
 0x229   : > { %v1086_v47 = vpack.c.bf16 %v2681_v29, %v2679_v28 }
 0x22b   : > { %1160 = vmatmul.bf16.vlgmr.msra.gmra.mxu1 %v1086_v47  ;;  %1198 = vmatmul.bf16.vlgmr.msra.gmra.mxu2 %v1086_v47 }
 0x22c   : > { %1212 = vmatmul.bf16.vlgmr.msra.gmra.mxu3 %v1086_v47 }
 0x23c   : > { %1348 = vmatmul.bf16.vlgmr.msrb.gmra.mxu3 %v1086_v47 }
 0x2a8   : > { %v1161_v31 = vpop.f32.mrf.mxu1 }
 0x2b0   : > { %v1163_v51 = vpop.f32.mrf.mxu1 }
 0x2b1   : > { %1180 = vmatpush.msra.mxu0 %v1163_v51 }
 0x2b3   : > { %1181 = vmatpush.msra.mxu0 %v1161_v31 }
 0x2b4   : > { %1790 = vmatmul.msk.f32.vlgmr.msra.gmra.mxu0 %vm489_vm0, %v2529_v30  ;;  %v1213_v30 = vpop.f32.mrf.mxu3 }
 0x2b5   : > { %1272 = vmatpush.bf16.msrb.mxu0 %v2491_v15 }
 0x2b9   : > { %1273 = vmatpush.bf16.msrb.mxu0 %v2497_v17  ;;  %v1199_v17 = vpop.f32.mrf.mxu2 }
 0x2bc   : > { %1791 = vmatmul.msk.f32.gmra.mxu0 %vm489_vm0, %v2555_v39 }
 0x2bd   : > { %1274 = vmatpush.bf16.msrb.mxu0 %v2506_v20 }
 0x2c1   : > { %1275 = vmatpush.bf16.msrb.mxu0 %v2515_v24  ;;  %v1201_v33 = vpop.f32.mrf.mxu2 }
 0x2c5   : > { %1276 = vmatpush.bf16.msrb.mxu0 %v2524_v27 }
 0x2c9   : > { %1277 = vmatpush.bf16.msrb.mxu0 %v2586_v48 }
 0x2cd   : > { %1278 = vmatpush.bf16.msrb.mxu0 %v2592_v52 }
 0x2d1   : > { %1279 = vmatpush.bf16.msrb.mxu0 %v2598_v56  ;;  %v1215_v56 = vpop.f32.mrf.mxu3 }
 0x2d9   : > { %v1349_v63 = vpop.f32.mrf.mxu3 }
 0x2da   : > { %v1350_v12 = vadd.f32 %v2645_v6, %v1349_v63 }
 0x331   : > { %v1183_v8 = vpop.f32.mrf.mxu0 }
 0x339   : > { %v1186_v9 = vpop.f32.mrf.mxu0 }
 0x33a   : > { %v1189_v15 = vpack.c.bf16 %v1186_v9, %v1183_v8 }
 0x33c   : > { %1226 = vmatmul.bf16.vlgmr.msrb.gmra.mxu1 %v1189_v15  ;;  %1280 = vmatmul.bf16.vlgmr.msrb.gmra.mxu0 %v1189_v15 }
 0x33d   : > { %1334 = vmatmul.bf16.vlgmr.msrb.gmra.mxu2 %v1189_v15 }
 0x3b9   : > { %v1227_v39 = vpop.f32.mrf.mxu1  ;;  %v1281_v20 = vpop.f32.mrf.mxu0 }
 0x3ba   : > { %v1228_v55 = vadd.f32 %v1227_v39, %v1199_v17  ;;  %v1282_v24 = vadd.f32 %v1281_v20, %v1213_v30  ;;  %v1351_v17 = vpop.f32.mrf.mxu3 }
 0x3bc   : > { %v1232_v27 = vadd.f32 %v1228_v55, %v2630_v13  ;;  %v1286_v48 = vadd.f32 %v1282_v24, %v2632_v14 }
 0x3be   : > { %v1792_v32 = vmul.f32 -1.442695, %v1232_v27  ;;  %v1794_v52 = vmul.f32 -1.442695, %v1286_v48 }
 0x3c0   : > { %1994 = vpow2.f32 %v1792_v32  ;;  %v1335_v10 = vpop.f32.mrf.mxu2  ;;  %v1352_v32 = vadd.f32 %v2645_v6, %v1351_v17 }
 0x3c1   : > { %1996 = vpow2.f32 %v1794_v52  ;;  %v1229_v35 = vpop.f32.mrf.mxu1  ;;  %v1283_v36 = vpop.f32.mrf.mxu0  ;;  %v1336_v23 = vadd.f32 %v2655_v26, %v1335_v10 }
 0x3c2   : > { %v1230_v37 = vadd.f32 %v1229_v35, %v1201_v33  ;;  %v1284_v38 = vadd.f32 %v1283_v36, %v1215_v56 }
 0x3c4   : > { %v1233_v41 = vadd.f32 %v1230_v37, %v2630_v13  ;;  %v1287_v43 = vadd.f32 %v1284_v38, %v2632_v14 }
 0x3c6   : > { %v1995_v45 = vpop.eup %1994  ;;  %v1793_v46 = vmul.f32 -1.442695, %v1233_v41  ;;  %v1795_v34 = vmul.f32 -1.442695, %v1287_v43 }
 0x3c7   : > { %v1997_v49 = vpop.eup %1996  ;;  %v1240_v50 = vadd.f32 1.0, %v1995_v45 }
 0x3c8   : > { %v1294_v53 = vadd.f32 1.0, %v1997_v49  ;;  %1998 = vpow2.f32 %v1793_v46  ;;  %v1337_v48 = vpop.f32.mrf.mxu2 }
 0x3c9   : > { %2000 = vrcp.f32 %v1240_v50  ;;  %v1253_v2 = vand.u32 2147483648, %v1240_v50  ;;  %v1251_v4 = vand.u32 2147483647, %v1240_v50  ;;  %vm1247_vm2 = vweird.f32 %v1240_v50 }
 0x3ca   : > { %2002 = vrcp.f32 %v1294_v53  ;;  %v1307_v1 = vand.u32 2147483648, %v1294_v53  ;;  %vm1301_vm6 = vweird.f32 %v1294_v53  ;;  %v1305_v44 = vand.u32 2147483647, %v1294_v53 }
 0x3cb   : > { %2004 = vpow2.f32 %v1795_v34  ;;  %v1254_v59 = vor.u32 1.1754944e-38, %v1253_v2  ;;  %vm1252_vm4 = vcmp.eq.f32.partialorder %v1251_v4, 8.507059e+37  ;;  %v1338_v37 = vadd.f32 %v2655_v26, %v1337_v48 }
 0x3cc   : > { %v1308_v20 = vor.u32 1.1754944e-38, %v1307_v1  ;;  %vm1306_vm10 = vcmp.eq.f32.partialorder %v1305_v44, 8.507059e+37 }
 0x3ce   : > { %v1999_v54 = vpop.eup %1998 }
 0x3cf   : > { %v2001_v57 = vpop.eup %2000  ;;  %v1241_v58 = vadd.f32 1.0, %v1999_v54 }
 0x3d0   : > { %v2003_v60 = vpop.eup %2002  ;;  %v1243_v61 = vmul.f32 %v2001_v57, %v1240_v50  ;;  %vm1248_vm0 = vweird.f32 %v2001_v57 }
 0x3d1   : > { %v2005_v40 = vpop.eup %2004  ;;  %v1297_v62 = vmul.f32 %v2003_v60, %v1294_v53  ;;  %2006 = vrcp.f32 %v1241_v58  ;;  %vm1249_vm3 = vmor %vm1247_vm2, %vm1248_vm0  ;;  %vm1302_vm5 = vweird.f32 %v2003_v60  ;;  %v1268_v31 = vand.u32 2147483648, %v1241_v58 }
 0x3d2   : > { %v1244_v13 = vsub.f32 1.0, %v1243_v61  ;;  %v2702_v14 = vadd.f32 1.0, %v2005_v40  ;;  %vm2708_vm7 = vmor %vm1301_vm6, %vm1302_vm5  ;;  %v1266_v15 = vand.u32 2147483647, %v1241_v58  ;;  %vm1262_vm9 = vweird.f32 %v1241_v58 }
 0x3d3   : > { %v1298_v0 = vsub.f32 1.0, %v1297_v62  ;;  %v1269_v27 = vor.u32 1.1754944e-38, %v1268_v31 }
 0x3d4   : > { %v1245_v3 = vmul.f32 %v2001_v57, %v1244_v13  ;;  %2008 = vrcp.f32 %v2702_v14  ;;  %vm1267_vm12 = vcmp.eq.f32.partialorder %v1266_v15, 8.507059e+37  ;;  %v1322_v36 = vand.u32 2147483648, %v2702_v14 }
 0x3d5   : > { %v1299_v7 = vmul.f32 %v2003_v60, %v1298_v0  ;;  %vm1316_vm14 = vweird.f32 %v2702_v14  ;;  %v1320_v43 = vand.u32 2147483647, %v2702_v14 }
 0x3d6   : > { %v1246_v11 = vadd.f32 %v2001_v57, %v1245_v3  ;;  %v1323_v34 = vor.u32 1.1754944e-38, %v1322_v36 }
 0x3d7   : > { %v2007_v42 = vpop.eup %2006  ;;  %v1300_v21 = vadd.f32 %v2003_v60, %v1299_v7  ;;  %vm1321_vm1 = vcmp.eq.f32.partialorder %v1320_v43, 8.507059e+37 }
 0x3d8   : > { %v1250_v16 = vsel %vm1249_vm3, %v2001_v57, %v1246_v11  ;;  %v1258_v18 = vmul.f32 %v2007_v42, %v1241_v58  ;;  %vm1263_vm8 = vweird.f32 %v2007_v42 }
 0x3d9   : > { %v1255_v19 = vsel %vm1252_vm4, %v1254_v59, %v1250_v16  ;;  %v1304_v30 = vsel %vm2708_vm7, %v2003_v60, %v1300_v21  ;;  %vm1264_vm11 = vmor %vm1262_vm9, %vm1263_vm8 }
 0x3da   : > { %v2009_v22 = vpop.eup %2008  ;;  %v1354_v5 = vmul.f32 %v1350_v12, %v1255_v19  ;;  %v1259_v25 = vsub.f32 1.0, %v1258_v18  ;;  %v1309_v52 = vsel %vm1306_vm10, %v1308_v20, %v1304_v30 }
 0x3db   : > { %v1312_v47 = vmul.f32 %v2009_v22, %v2702_v14  ;;  %vm1317_vm13 = vweird.f32 %v2009_v22  ;;  %v1360_v41 = vsub.f32 1.0, %v1309_v52  ;;  %v1364_v49 = vmul.f32 %v1309_v52, %v2679_v28 }
 0x3dc   : > { %v1356_v8 = vadd.f32 %v1354_v5, %v1336_v23  ;;  %v1260_v9 = vmul.f32 %v2007_v42, %v1259_v25  ;;  %vm1318_vm15 = vmor %vm1316_vm14, %vm1317_vm13 }
 0x3dd   : > { %v1313_v39 = vsub.f32 1.0, %v1312_v47 }
 0x3de   : > { %2010 = vtanh.f32 %v1356_v8  ;;  %v1261_v55 = vadd.f32 %v2007_v42, %v1260_v9 }
 0x3df   : > { %v1314_v24 = vmul.f32 %v2009_v22, %v1313_v39 }
 0x3e0   : > { %v1265_v33 = vsel %vm1264_vm11, %v2007_v42, %v1261_v55 }
 0x3e1   : > { %v1270_v56 = vsel %vm1267_vm12, %v1269_v27, %v1265_v33  ;;  %v1315_v35 = vadd.f32 %v2009_v22, %v1314_v24 }
 0x3e2   : > { %v1355_v38 = vmul.f32 %v1352_v32, %v1270_v56 }
 0x3e3   : > { %v1319_v50 = vsel %vm1318_vm15, %v2009_v22, %v1315_v35 }
 0x3e4   : > { %v2011_v45 = vpop.eup %2010  ;;  %v1357_v6 = vadd.f32 %v1355_v38, %v1338_v37  ;;  %v1324_v26 = vsel %vm1321_vm1, %v1323_v34, %v1319_v50 }
 0x3e5   : > { %v1362_v46 = vmul.f32 %v2011_v45, %v1360_v41  ;;  %v1361_v54 = vsub.f32 1.0, %v1324_v26  ;;  %v1365_v58 = vmul.f32 %v1324_v26, %v2681_v29 }
 0x3e6   : > { %2012 = vtanh.f32 %v1357_v6 }
 0x3e7   : > { %v1366_v53 = vadd.f32 %v1364_v49, %v1362_v46 }
 0x3e9   : > { %1368 = vst [vmem:[%s381_s11] sm:$0xff] %v1366_v53 }
 0x3ec   : > { %v2013_v28 = vpop.eup %2012 }
 0x3ed   : > { %v1363_v57 = vmul.f32 %v2013_v28, %v1361_v54 }
 0x3ef   : > { %v1367_v60 = vadd.f32 %v1365_v58, %v1363_v57 }
 0x3f1   : > { %1369 = vst [vmem:[%s381_s11 + $0x8] sm:$0xff] %v1367_v60 }
 0x3f2   : > { %2221 = shalt.err (!%p2218_p9)
}
 0x3f3   : > { %s2285_s20 = smov 128   ;;  %s2286_s19 = smov 8  }
 0x3f4   : > { %1889 = dma.vmem_to_hbm [thread:$0]  (%p2416_p13), %s1384_s17, 256, %s1386_s21, %s1371_s8, %s2285_s20, %s2285_s20, %s2286_s19  }
 0x3f5 PF: > { %s1400_s22 = sand.u32 1, %s2260_s24   ;;  %p2778_p10 = scmp.ge.s32.totalorder %s2272_s27, 2 }
 0x3f6   : > { %s1401_s29 = scalar_lea.sflag [#allocation4], %s1400_s22 }
 0x3f7   : > { %p1912_p11 = pnand %p2778_p10, %p2421_p4 }
 0x3f9   : > { %p1913_p0 = pneg %p1912_p11 }
 0x3fb   : > { %2255 = dma.done.wait (%p1913_p0), %s1401_s29, 256  }
 0x3fc   : > { %2257 = vsyncadd (%p1913_p0), %s1401_s29, 4294967040  ;;  %p23_p2 = scmp.ge.s32.totalorder %s2396_s30, 4   ;;  %s2779_s24 = smov %s2264_s25 }
 0x3fd   : > { %s2780_s25 = smov %s2268_s26  ;;  %s2781_s26 = smov %s2408_s23 }
 0x3fe   : > { %s2782_s27 = smov %s2396_s30  ;;  %25 = sbr.rel (!%p23_p2) target bundleno = 10 (0xa), region = 122 }
 0x403   :  { %1407 = vsyncpa [#allocation3], 1 }
 0x404   :  { %1409 = vsyncpa [#allocation3 + $0x1], 1 }
 0x405   :  { %1410 = vsyncpa [#allocation6], 1 }
 0x406   :  { %1411 = vsyncpa [#allocation9], 1 }
 0x407   :  { %1412 = vsyncpa [#allocation12], 1 }
 0x408   :  { %1413 = vsyncpa [#allocation4], 1 }
 0x409   :  { %1415 = vsyncpa [#allocation4 + $0x1], 1 }

</bundles_post_ra>
